<compile_context>
chip_gen: v7x
topology: tpu7x:2x2x1
jax: 0.10.0
libtpu: 0.0.40
codegen_flags: <defaults>
</compile_context>

<pallas_src>
import functools

import jax
import jax.numpy as jnp
from jax.experimental import pallas as pl
from jax.experimental.pallas import tpu as pltpu


# ----------------------------------------------------------------------------
# tiling helpers
# ----------------------------------------------------------------------------
_ROW_TILES = (512, 256, 128, 64, 32, 16, 8)     # elementwise / BN row tiles
_MM_M_TILES = (256, 128, 64, 32, 16, 8)         # matmul M tiles (256 feeds v6e/v7x MXU)
_MM_N_TILES = (256, 128)                        # matmul N tiles


def _pick_tile(n, candidates):
    for c in candidates:
        if n >= c and n % c == 0:
            return c
    return n  # single full block (always legal: equals the full dim)


# ----------------------------------------------------------------------------
# Pallas kernels
# ----------------------------------------------------------------------------
def _matmul_bias_kernel(x_ref, w_ref, b_ref, o_ref):
    # bf16 MXU matmul with f32 accumulation; bias fused in the epilogue.
    acc = jnp.dot(x_ref[...].astype(jnp.bfloat16), w_ref[...],
                  preferred_element_type=jnp.float32)
    o_ref[...] = acc + b_ref[...]


def matmul_bias(x, w, b):
    """out = x @ w + b.  x:(M,K) f32/bf16, w:(K,N) bf16, b:(N,) f32 -> (M,N) f32."""
    M, K = x.shape
    _, N = w.shape
    tm = _pick_tile(M, _MM_M_TILES)
    tn = _pick_tile(N, _MM_N_TILES)
    return pl.pallas_call(
        _matmul_bias_kernel,
        out_shape=jax.ShapeDtypeStruct((M, N), jnp.float32),
        grid=(M // tm, N // tn),
        in_specs=[
            pl.BlockSpec((tm, K), lambda i, j: (i, 0)),   # x tile resident across j
            pl.BlockSpec((K, tn), lambda i, j: (0, j)),   # bf16 weight column block
            pl.BlockSpec((1, tn), lambda i, j: (0, j)),
        ],
        out_specs=pl.BlockSpec((tm, tn), lambda i, j: (i, j)),
        compiler_params=pltpu.CompilerParams(
            dimension_semantics=("parallel", "parallel")),
    )(x, w, b.reshape(1, N))


def _bn_stats_kernel(x_ref, s_ref, ss_ref):
    # Tiled reduction: per-channel sum and sum-of-squares accumulated into
    # resident (1, C) output blocks across the "arbitrary" row-tile axis.
    @pl.when(pl.program_id(0) == 0)
    def _():
        s_ref[...] = jnp.zeros_like(s_ref)
        ss_ref[...] = jnp.zeros_like(ss_ref)

    x = x_ref[...]
    s_ref[...] += jnp.sum(x, axis=0, keepdims=True)
    ss_ref[...] += jnp.sum(x * x, axis=0, keepdims=True)


def bn_scale_shift(x2d, gamma, beta, eps=1e-5):
    """Train-mode BatchNorm statistics -> per-channel (scale, shift), (1, C) each."""
    R, C = x2d.shape
    tr = _pick_tile(R, _ROW_TILES)
    s, ss = pl.pallas_call(
        _bn_stats_kernel,
        out_shape=(jax.ShapeDtypeStruct((1, C), jnp.float32),
                   jax.ShapeDtypeStruct((1, C), jnp.float32)),
        grid=(R // tr,),
        in_specs=[pl.BlockSpec((tr, C), lambda i: (i, 0))],
        out_specs=(pl.BlockSpec((1, C), lambda i: (0, 0)),
                   pl.BlockSpec((1, C), lambda i: (0, 0))),
        compiler_params=pltpu.CompilerParams(dimension_semantics=("arbitrary",)),
    )(x2d)
    mean = s / R
    var = jnp.maximum(ss / R - mean * mean, 0.0)
    scale = gamma.reshape(1, C) * jax.lax.rsqrt(var + eps)
    shift = beta.reshape(1, C) - mean * scale
    return scale, shift


def _affine_kernel(relu, has_res, *refs):
    # y = x * scale + shift [+ residual] [relu] — one tiled elementwise pass.
    if has_res:
        x_ref, sc_ref, sh_ref, res_ref, o_ref = refs
    else:
        x_ref, sc_ref, sh_ref, o_ref = refs
    y = x_ref[...] * sc_ref[...] + sh_ref[...]
    if has_res:
        y = y + res_ref[...]
    if relu:
        y = jnp.maximum(y, 0.0)
    o_ref[...] = y


def bn_apply(x2d, scale, shift, relu, residual=None):
    R, C = x2d.shape
    tr = _pick_tile(R, _ROW_TILES)
    has_res = residual is not None
    in_specs = [pl.BlockSpec((tr, C), lambda i: (i, 0)),
                pl.BlockSpec((1, C), lambda i: (0, 0)),
                pl.BlockSpec((1, C), lambda i: (0, 0))]
    args = [x2d, scale, shift]
    if has_res:
        in_specs.append(pl.BlockSpec((tr, C), lambda i: (i, 0)))
        args.append(residual)
    return pl.pallas_call(
        functools.partial(_affine_kernel, relu, has_res),
        out_shape=jax.ShapeDtypeStruct((R, C), jnp.float32),
        grid=(R // tr,),
        in_specs=in_specs,
        out_specs=pl.BlockSpec((tr, C), lambda i: (i, 0)),
        compiler_params=pltpu.CompilerParams(dimension_semantics=("parallel",)),
    )(*args)


def _mhsa_kernel(q_ref, k_ref, v_ref, rel_ref, o_ref):
    # Single launch batched over all (batch, head) pairs.
    # q, k, v, rel: (N, L, d) with d lane-dense (d = 128).
    q = q_ref[...].astype(jnp.bfloat16)
    k = k_ref[...].astype(jnp.bfloat16)
    v = v_ref[...].astype(jnp.bfloat16)
    rel = rel_ref[...].astype(jnp.bfloat16)
    # similarity = q^T k ; query_pos = rel @ q       (both (N, L, L))
    sim = jnp.einsum('nld,nmd->nlm', q, k, preferred_element_type=jnp.float32)
    qpos = jnp.einsum('nld,nmd->nlm', rel, q, preferred_element_type=jnp.float32)
    energy = sim + qpos
    energy = energy - jnp.max(energy, axis=-1, keepdims=True)
    p = jnp.exp(energy)
    attn = p * pl.reciprocal(jnp.sum(p, axis=-1, keepdims=True), approx=True)
    # out = attn @ v   ->  (N, L, d), equivalent to PyTorch's v @ attn^T
    out = jnp.einsum('nlm,nmd->nld', attn.astype(jnp.bfloat16), v,
                     preferred_element_type=jnp.float32)
    o_ref[...] = out


def mhsa_attention(q, k, v, rel):
    """q, k, v, rel: (N, L, d) f32 with N = batch * heads -> (N, L, d) f32."""
    N, L, d = q.shape
    spec = pl.BlockSpec((N, L, d), lambda i: (0, 0, 0))
    return pl.pallas_call(
        _mhsa_kernel,
        out_shape=jax.ShapeDtypeStruct((N, L, d), jnp.float32),
        grid=(1,),
        in_specs=[spec, spec, spec, spec],
        out_specs=spec,
    )(q, k, v, rel)


# ----------------------------------------------------------------------------
# JAX glue: im2col, pooling, parameter init, model assembly
# ----------------------------------------------------------------------------
def im2col(x, k, stride, pad):
    B, Hd, Wd, C = x.shape
    xp = jnp.pad(x, ((0, 0), (pad, pad), (pad, pad), (0, 0))).astype(jnp.bfloat16)
    Ho = (Hd + 2 * pad - k) // stride + 1
    Wo = (Wd + 2 * pad - k) // stride + 1
    patches = []
    for i in range(k):
        for j in range(k):
            patches.append(xp[:, i:i + (Ho - 1) * stride + 1:stride,
                              j:j + (Wo - 1) * stride + 1:stride, :])
    cols = jnp.stack(patches, axis=3)                    # (B, Ho, Wo, k*k, C) bf16
    return cols.reshape(B * Ho * Wo, k * k * C), Ho, Wo


def conv2d(x, p, k, stride, pad):
    B, Hd, Wd, C = x.shape
    if k == 1 and pad == 0:
        xs = x[:, ::stride, ::stride, :]
        _, Ho, Wo, _ = xs.shape
        cols = xs.reshape(B * Ho * Wo, C)
    else:
        cols, Ho, Wo = im2col(x, k, stride, pad)
    out = matmul_bias(cols, p["w"], p["b"])
    return out.reshape(B, Ho, Wo, -1)


def bn(x, p, relu, residual=None):
    """Train-mode BatchNorm, optionally fused with residual add + ReLU."""
    B, Hd, Wd, C = x.shape
    x2d = x.reshape(B * Hd * Wd, C)
    res2d = residual.reshape(B * Hd * Wd, C) if residual is not None else None
    scale, shift = bn_scale_shift(x2d, p["g"], p["b"])
    y = bn_apply(x2d, scale, shift, relu, res2d)
    return y.reshape(B, Hd, Wd, C)


def maxpool_3x3_s2_p1(x):
    return jax.lax.reduce_window(
        x, -jnp.inf, jax.lax.max,
        (1, 3, 3, 1), (1, 2, 2, 1),
        [(0, 0), (1, 1), (1, 1), (0, 0)])


def avgpool_2x2(x):
    B, Hd, Wd, C = x.shape
    return x.reshape(B, Hd // 2, 2, Wd // 2, 2, C).mean(axis=(2, 4))


def mhsa_forward(x, p, heads):
    # x: (B, Wd, Hd, C) channels-last (PyTorch dims 2,3 preserved).
    B, Wd, Hd, C = x.shape
    d = C // heads
    L = Wd * Hd
    cols = x.reshape(B * L, C)

    def to_nld(y2d):
        return (y2d.reshape(B, L, heads, d)
                .transpose(0, 2, 1, 3)
                .reshape(B * heads, L, d))

    q = to_nld(matmul_bias(cols, p["q"]["w"], p["q"]["b"]))
    k = to_nld(matmul_bias(cols, p["k"]["w"], p["k"]["b"]))
    v = to_nld(matmul_bias(cols, p["v"]["w"], p["v"]["b"]))

    rel = (p["rel_h"] + p["rel_w"]).reshape(heads, d, L).transpose(0, 2, 1)   # (H, L, d)
    rel = jnp.broadcast_to(rel[None], (B, heads, L, d)).reshape(B * heads, L, d)

    out = mhsa_attention(q, k, v, rel)                                        # (B*H, L, d)
    out = out.reshape(B, heads, Wd, Hd, d).transpose(0, 2, 3, 1, 4)
    return out.reshape(B, Wd, Hd, C)


def block_forward(x, p, stride, mhsa, heads):
    identity = x
    out = conv2d(x, p["conv1"], k=1, stride=1, pad=0)
    out = bn(out, p["bn1"], relu=True)
    if mhsa:
        out = mhsa_forward(out, p["mhsa"], heads)
        if stride == 2:
            out = avgpool_2x2(out)
    else:
        out = conv2d(out, p["conv2"], k=3, stride=stride, pad=1)
    out = bn(out, p["bn2"], relu=True)
    out = conv2d(out, p["conv3"], k=1, stride=1, pad=0)
    if "downsample" in p:
        identity = conv2d(identity, p["downsample"]["conv"], k=1, stride=stride, pad=0)
        identity = bn(identity, p["downsample"]["bn"], relu=False)
    # bn3 + residual add + ReLU fused into a single tiled pass.
    return bn(out, p["bn3"], relu=True, residual=identity)


# ------------------------- parameter initialization -------------------------
def init_conv(key, cin, cout, k, scale=0.05):
    kw, kb = jax.random.split(key)
    w = jax.random.normal(kw, (k, k, cin, cout), jnp.float32) * scale
    b = jax.random.normal(kb, (cout,), jnp.float32) * scale
    return {"w": w.reshape(k * k * cin, cout).astype(jnp.bfloat16), "b": b}


def init_bn(key, c, scale=0.05):
    kg, kb = jax.random.split(key)
    return {"g": 1.0 + jax.random.normal(kg, (c,), jnp.float32) * scale,
            "b": jax.random.normal(kb, (c,), jnp.float32) * scale}


def init_block(key, in_ch, ch, stride, mhsa, heads, shape, downsample, expansion=4):
    ks = iter(jax.random.split(key, 16))
    p = {"conv1": init_conv(next(ks), in_ch, ch, 1),
         "bn1": init_bn(next(ks), ch)}
    if mhsa:
        d = ch // heads
        w_, h_ = int(shape[0]), int(shape[1])
        p["mhsa"] = {
            "q": init_conv(next(ks), ch, ch, 1),
            "k": init_conv(next(ks), ch, ch, 1),
            "v": init_conv(next(ks), ch, ch, 1),
            "rel_h": jax.random.normal(next(ks), (heads, d, 1, h_), jnp.float32) * 0.05,
            "rel_w": jax.random.normal(next(ks), (heads, d, w_, 1), jnp.float32) * 0.05,
        }
    else:
        p["conv2"] = init_conv(next(ks), ch, ch, 3)
    p["bn2"] = init_bn(next(ks), ch)
    p["conv3"] = init_conv(next(ks), ch, ch * expansion, 1)
    p["bn3"] = init_bn(next(ks), ch * expansion)
    if downsample:
        p["downsample"] = {"conv": init_conv(next(ks), in_ch, ch * expansion, 1),
                           "bn": init_bn(next(ks), ch * expansion)}
    return p


def init_botnet(key, layers, in_channels, num_classes, shape, heads):
    expansion = 4
    keys = iter(jax.random.split(key, 256))
    params = {"conv1": init_conv(next(keys), in_channels, 64, 7),
              "bn1": init_bn(next(keys), 64),
              "layers": []}
    channels = 64
    cur_shape = [s // 4 for s in shape]
    cfg = [(layers[0], 64, 1, False), (layers[1], 128, 2, False),
           (layers[2], 256, 2, False), (layers[3], 512, 2, True)]
    for n_block, ch, stride, use_mhsa in cfg:
        blocks = []
        need_ds = (stride != 1) or (channels != ch * expansion)
        blocks.append((init_block(next(keys), channels, ch, stride, use_mhsa,
                                  heads, cur_shape, need_ds),
                       {"stride": stride, "mhsa": use_mhsa}))
        if stride == 2:
            cur_shape = [s // 2 for s in cur_shape]
        channels = ch * expansion
        for _ in range(n_block - 1):
            blocks.append((init_block(next(keys), channels, ch, 1, use_mhsa,
                                      heads, cur_shape, False),
                           {"stride": 1, "mhsa": use_mhsa}))
        params["layers"].append(blocks)
    kfc_w, kfc_b = jax.random.split(next(keys))
    params["fc"] = {"w": jax.random.normal(kfc_w, (512 * expansion, num_classes),
                                           jnp.float32) * 0.05,
                    "b": jax.random.normal(kfc_b, (num_classes,), jnp.float32) * 0.05}
    return params


def botnet_forward(params, x_nchw, heads):
    # NCHW -> channels-last (B, dim2, dim3, C); all compute stays channels-last.
    x = jnp.transpose(x_nchw, (0, 2, 3, 1)).astype(jnp.float32)
    x = conv2d(x, params["conv1"], k=7, stride=2, pad=3)
    x = bn(x, params["bn1"], relu=True)
    x = maxpool_3x3_s2_p1(x)
    for layer in params["layers"]:
        for bp, meta in layer:
            x = block_forward(x, bp, meta["stride"], meta["mhsa"], heads)
    x = jnp.mean(x, axis=(1, 2))                  # AdaptiveAvgPool2d((1,1)) + flatten
    # Final FC: M=2, N=10 — too small for a Pallas launch (per perf review).
    logits = x @ params["fc"]["w"] + params["fc"]["b"]
    return logits


# ----------------------------------------------------------------------------
if __name__ == "__main__":
    key = jax.random.PRNGKey(0)
    k_param, k_input = jax.random.split(key)

    layers = [1, 1, 1, 1]        # small BoTNet
    in_channels = 3
    num_classes = 10
    shape = (32, 32)
    heads = 4

    params = init_botnet(k_param, layers, in_channels, num_classes, shape, heads)
    x = jax.random.normal(k_input, (2, in_channels, shape[0], shape[1]), jnp.float32)

    logits = botnet_forward(params, x, heads)
    jax.block_until_ready(logits)
    assert logits.shape == (2, num_classes)
    print("KERNEL_OK")
</pallas_src>

<mosaic_0001>
module attributes {stable_mosaic.version = 11 : i64} {
  func.func @_matmul_bias_kernel(%arg0: i32, %arg1: i32, %arg2: memref<256x147xbf16, #tpu.memory_space<vmem>>, %arg3: memref<147x64xbf16, #tpu.memory_space<vmem>>, %arg4: memref<1x64xf32, #tpu.memory_space<vmem>>, %arg5: memref<256x64xf32, #tpu.memory_space<vmem>>) attributes {dimension_semantics = [#tpu.dimension_semantics<parallel>, #tpu.dimension_semantics<parallel>], iteration_bounds = array<i64: 2, 1>, scalar_prefetch = 0 : i64, scratch_operands = 0 : i64, tpu.core_type = #tpu.core_type<tc>, window_params = [{transform_indices = @transform_0, window_bounds = array<i64: 256, 147>}, {transform_indices = @transform_1, window_bounds = array<i64: 147, 64>}, {transform_indices = @transform_2, window_bounds = array<i64: 1, 64>}, {transform_indices = @transform_3, window_bounds = array<i64: 256, 64>}]} {
    %c0 = arith.constant 0 : index
    %c0_0 = arith.constant 0 : index
    %0 = vector.load %arg2[%c0, %c0_0] : memref<256x147xbf16, #tpu.memory_space<vmem>>, vector<256x147xbf16>
    %c0_1 = arith.constant 0 : index
    %c0_2 = arith.constant 0 : index
    %1 = vector.load %arg3[%c0_1, %c0_2] : memref<147x64xbf16, #tpu.memory_space<vmem>>, vector<147x64xbf16>
    %cst = arith.constant dense<0.000000e+00> : vector<256x64xf32>
    %2 = tpu.matmul %0, %1, %cst {dimension_numbers = #tpu.dot_dimension_numbers<[1], [0], [0], [1], [0, 0, 1, 1], [], []>} : vector<256x147xbf16>, vector<147x64xbf16>, vector<256x64xf32> -> vector<256x64xf32>
    %c0_3 = arith.constant 0 : index
    %c0_4 = arith.constant 0 : index
    %3 = vector.load %arg4[%c0_3, %c0_4] : memref<1x64xf32, #tpu.memory_space<vmem>>, vector<1x64xf32>
    %4 = vector.broadcast %3 : vector<1x64xf32> to vector<256x64xf32>
    %5 = arith.addf %2, %4 : vector<256x64xf32>
    %c0_5 = arith.constant 0 : index
    %c0_6 = arith.constant 0 : index
    %6 = vector.load %arg5[%c0_5, %c0_6] : memref<256x64xf32, #tpu.memory_space<vmem>>, vector<256x64xf32>
    tpu.vector_store %arg5[%c0_5, %c0_6], %5 {strides = array<i32>} : memref<256x64xf32, #tpu.memory_space<vmem>>, vector<256x64xf32>,
    return
  }
  func.func @transform_0(%arg0: i32, %arg1: i32) -> (i32, i32) {
    %c0_i32 = arith.constant 0 : i32
    %c0_i32_0 = arith.constant 0 : i32
    return %arg0, %c0_i32 : i32, i32
  }
  func.func @transform_1(%arg0: i32, %arg1: i32) -> (i32, i32) {
    %c0_i32 = arith.constant 0 : i32
    %c0_i32_0 = arith.constant 0 : i32
    return %c0_i32, %arg1 : i32, i32
  }
  func.func @transform_2(%arg0: i32, %arg1: i32) -> (i32, i32) {
    %c0_i32 = arith.constant 0 : i32
    %c0_i32_0 = arith.constant 0 : i32
    return %c0_i32, %arg1 : i32, i32
  }
  func.func @transform_3(%arg0: i32, %arg1: i32) -> (i32, i32) {
    %c0_i32 = arith.constant 0 : i32
    return %arg0, %arg1 : i32, i32
  }
}

</mosaic_0001>

<bundles_post_ra>
// kernel: tpu_custom_call.1
= control target key start
LH: loop header
LB: loop body
LE: loop exit
PB: predicated region body
PF: predicated region fallthrough
CT: control target
= control target key end

     0   :  { %s1064_s12 = smov 0   ;;  %s1066_s13 = smov 0   ;;  %s1287_s0 = inlined_call_operand.vmem [shape: bf16[512,147], index: 0, kind: input, shape index: {}]   ;;  %s1288_s1 = inlined_call_operand.vmem [shape: bf16[147,64], index: 1, kind: input, shape index: {}]   ;;  %s1289_s2 = inlined_call_operand.vmem [shape: f32[1,64], index: 2, kind: input, shape index: {}]   ;;  %s1290_s3 = inlined_call_operand.vmem [shape: f32[512,64], index: 3, kind: output, shape index: {}]  }
   0x1   :  { %s1068_s14 = smov 0  }
   0x2 LB: > { %s25_s15 = sadd.s32 1, %s1036_s13  ;;  %p846_p0 = scmp.ge.s32.totalorder %s1040_s14, 1  ;;  %s1040_s14 = sphi %s1068_s14, %s13_s14   ;;  %s1036_s13 = sphi %s1066_s13, %s1292_s13   ;;  %s1032_s12 = sphi %s1064_s12, %s1291_s12  }
   0x3   : > { %p27_p1 = scmp.ge.s32.totalorder %s25_s15, 2  ;;  %p170_p2 = scmp.lt.s32.totalorder %s1040_s14, 3 }
   0x5   : > { %s1294_s15 = smov (%p27_p1, %s25_s15), 0  ;;  %p171_p3 = pnand %p846_p0, %p170_p2 }
   0x6   : > { %v960_v0 = vld [vmem:[%s1288_s1] sm:$0xff] (!%p171_p3)   ;;  %v1042_v1 = vmov (!%p171_p3), 0   ;;  %v961_v2 = vld [vmem:[%s1288_s1 + $0x8] sm:$0xff] (!%p171_p3)   ;;  %v962_v3 = vld [vmem:[%s1288_s1 + $0x10] sm:$0xff] (!%p171_p3)   ;;  %s847_s22 = sshll.u32 (!%p171_p3), %s1032_s12, 5  ;;  %vm488_vm0 = vcmask (!%p171_p3), 154624  }
   0x7   : > { %174 = sbr.rel (%p171_p3) target bundleno = 320 (0x140), region = 32  ;;  %544 = vmatprep.subr.bf16.mxu0 (!%p171_p3), %v1042_v1  ;;  %914 = vmatprep.subr.bf16.mxu1 (!%p171_p3), %v1042_v1  ;;  %p206_p4 = scmp.lt.s32.totalorder (!%p171_p3), %s847_s22, 63  ;;  %v963_v4 = vld [vmem:[%s1288_s1 + $0x18] sm:$0xff] (!%p171_p3)   ;;  %v964_v5 = vld [vmem:[%s1288_s1 + $0x20] sm:$0xff] (!%p171_p3)   ;;  %v965_v8 = vld [vmem:[%s1288_s1 + $0x28] sm:$0xff] (!%p171_p3)   ;;  %vm537_vm1 = vcmask (!%p171_p3), 1040384  }
   0x8   : > { %545 = vmatpush1.bf16.msra.mxu0 (!%p171_p3), %v960_v0  ;;  %924 = vmatpush1.bf16.msra.mxu1 (!%p171_p3), %v960_v0  ;;  %v966_v9 = vld [vmem:[%s1288_s1 + $0x30] sm:$0xff] (!%p171_p3)   ;;  %v967_v10 = vld [vmem:[%s1288_s1 + $0x38] sm:$0xff] (!%p171_p3)   ;;  %vm538_vm2 = vcmask (!%p171_p3), 1041408   ;;  %v1043_v11 = vmov (!%p171_p3), 65535   ;;  %v968_v13 = vld [vmem:[%s1288_s1 + $0x40] sm:$0xff] (!%p171_p3)   ;;  %vm705_vm3 = vcmask (!%p171_p3), 523264  }
   0x9   : > { %546 = vmatprep.subr.bf16.mxu0 (!%p171_p3), %v1042_v1  ;;  %915 = vmatprep.subr.bf16.mxu1 (!%p171_p3), %v1042_v1  ;;  %v539_v12 = vsel (!%p171_p3), %vm537_vm1, 4294967295, %v1043_v11  ;;  %v969_v14 = vld [vmem:[%s1288_s1 + $0x48] ss:$0 sps:$4 sm:$0x33] (!%p171_p3)   ;;  %v1173_v47 = vld [vmem:[%s1289_s2] ss:$0 sm:$0xff] (!%p171_p3) }
   0xa   : > { %v540_v15 = vsel (!%p171_p3), %vm538_vm2, %v539_v12, 0 }
   0xb   : > { %v542_v16 = vand.u32 (!%p171_p3), %v969_v14, %v540_v15 }
   0xc   : > { %547 = vmatpush1.bf16.msra.mxu0 (!%p171_p3), %v961_v2  ;;  %925 = vmatpush1.bf16.msra.mxu1 (!%p171_p3), %v961_v2 }
   0xd   : > { %548 = vmatprep.subr.bf16.mxu0 (!%p171_p3), %v1042_v1  ;;  %916 = vmatprep.subr.bf16.mxu1 (!%p171_p3), %v1042_v1 }
   0xe   : > { %s1296_s22 = smov (!%p206_p4, %s847_s22), 63 }
   0xf   : > { %s913_s25 = sshll.u32 %s1296_s22, 3 }
  0x10   : > { %549 = vmatpush1.bf16.msra.mxu0 %v962_v3  ;;  %926 = vmatpush1.bf16.msra.mxu1 %v962_v3  ;;  %s1102_s28 = scalar_lea.vmem %s1287_s0, %s913_s25  ;;  %s1180_s21 = scalar_lea.vmem %s1290_s3, %s913_s25 }
  0x11   : > { %550 = vmatprep.subr.bf16.mxu0 %v1042_v1  ;;  %917 = vmatprep.subr.bf16.mxu1 %v1042_v1  ;;  %v972_v6 = vld [vmem:[%s1102_s28 + $0x4] ss:$8 sps:$4 sm:$0xff]   ;;  %v970_v17 = vld [vmem:[%s1102_s28] ss:$8 sps:$4 sm:$0xff]   ;;  %v976_v19 = vld [vmem:[%s1102_s28 + $0x14] ss:$8 sps:$4 sm:$0xff]  }
  0x12   : > { %v975_v7 = vld [vmem:[%s1102_s28 + $0x84] ss:$8 sps:$4 sm:$0xff]   ;;  %895 = vmatprep.mubr.msk.bf16.mxu0 %vm488_vm0, %v972_v6  ;;  %v973_v18 = vld [vmem:[%s1102_s28 + $0x80] ss:$8 sps:$4 sm:$0xff]   ;;  %v978_v20 = vld [vmem:[%s1102_s28 + $0x94] ss:$8 sps:$4 sm:$0xff]  }
  0x13   : > { %903 = vmatprep.mubr.msk.bf16.mxu1 %vm488_vm0, %v975_v7  ;;  %v980_v21 = vld [vmem:[%s1102_s28 + $0x10] ss:$8 sps:$4 sm:$0xff]   ;;  %v982_v23 = vld [vmem:[%s1102_s28 + $0x24] ss:$8 sps:$4 sm:$0xff]   ;;  %v986_v25 = vld [vmem:[%s1102_s28 + $0x20] ss:$8 sps:$4 sm:$0xff]  }
  0x14   : > { %551 = vmatpush1.bf16.msra.mxu0 %v963_v4  ;;  %927 = vmatpush1.bf16.msra.mxu1 %v963_v4  ;;  %v981_v22 = vld [vmem:[%s1102_s28 + $0x90] ss:$8 sps:$4 sm:$0xff]   ;;  %v984_v24 = vld [vmem:[%s1102_s28 + $0xa4] ss:$8 sps:$4 sm:$0xff]   ;;  %v987_v26 = vld [vmem:[%s1102_s28 + $0xa0] ss:$8 sps:$4 sm:$0xff]  }
  0x15   : > { %552 = vmatprep.subr.bf16.mxu0 %v1042_v1  ;;  %918 = vmatprep.subr.bf16.mxu1 %v1042_v1  ;;  %v988_v27 = vld [vmem:[%s1102_s28 + $0x34] ss:$8 sps:$4 sm:$0xff]   ;;  %v992_v29 = vld [vmem:[%s1102_s28 + $0x30] ss:$8 sps:$4 sm:$0xff]   ;;  %v994_v31 = vld [vmem:[%s1102_s28 + $0x44] ss:$8 sps:$4 sm:$0xff]  }
  0x16   : > { %v990_v28 = vld [vmem:[%s1102_s28 + $0xb4] ss:$8 sps:$4 sm:$0xff]   ;;  %v993_v30 = vld [vmem:[%s1102_s28 + $0xb0] ss:$8 sps:$4 sm:$0xff]   ;;  %v996_v32 = vld [vmem:[%s1102_s28 + $0xc4] ss:$8 sps:$4 sm:$0xff]  }
  0x17   : > { %v998_v33 = vld [vmem:[%s1102_s28 + $0x40] ss:$8 sps:$4 sm:$0xff]   ;;  %v1000_v35 = vld [vmem:[%s1102_s28 + $0x54] ss:$8 sps:$4 sm:$0xff]   ;;  %v1004_v37 = vld [vmem:[%s1102_s28 + $0x50] ss:$8 sps:$4 sm:$0xff]  }
  0x18   : > { %553 = vmatpush1.bf16.msra.mxu0 %v964_v5  ;;  %928 = vmatpush1.bf16.msra.mxu1 %v964_v5  ;;  %v999_v34 = vld [vmem:[%s1102_s28 + $0xc0] ss:$8 sps:$4 sm:$0xff]   ;;  %v1002_v36 = vld [vmem:[%s1102_s28 + $0xd4] ss:$8 sps:$4 sm:$0xff]   ;;  %v1005_v38 = vld [vmem:[%s1102_s28 + $0xd0] ss:$8 sps:$4 sm:$0xff]  }
  0x19   : > { %554 = vmatprep.subr.bf16.mxu0 %v1042_v1  ;;  %919 = vmatprep.subr.bf16.mxu1 %v1042_v1  ;;  %v1006_v39 = vld [vmem:[%s1102_s28 + $0x64] ss:$8 sps:$4 sm:$0xff]   ;;  %v1010_v41 = vld [vmem:[%s1102_s28 + $0x60] ss:$8 sps:$4 sm:$0xff]   ;;  %v1012_v43 = vld [vmem:[%s1102_s28 + $0x74] ss:$8 sps:$4 sm:$0xff]  }
  0x1a   : > { %v1008_v40 = vld [vmem:[%s1102_s28 + $0xe4] ss:$8 sps:$4 sm:$0xff]   ;;  %v1011_v42 = vld [vmem:[%s1102_s28 + $0xe0] ss:$8 sps:$4 sm:$0xff]   ;;  %v1014_v44 = vld [vmem:[%s1102_s28 + $0xf4] ss:$8 sps:$4 sm:$0xff]  }
  0x1b   : > { %v1016_v45 = vld [vmem:[%s1102_s28 + $0x70] ss:$8 sps:$4 sm:$0xff]  }
  0x1c   : > { %555 = vmatpush1.bf16.msra.mxu0 %v965_v8  ;;  %929 = vmatpush1.bf16.msra.mxu1 %v965_v8  ;;  %v1017_v46 = vld [vmem:[%s1102_s28 + $0xf0] ss:$8 sps:$4 sm:$0xff]  }
  0x1d   : > { %556 = vmatprep.subr.bf16.mxu0 %v1042_v1  ;;  %920 = vmatprep.subr.bf16.mxu1 %v1042_v1 }
  0x20   : > { %557 = vmatpush1.bf16.msra.mxu0 %v966_v9  ;;  %930 = vmatpush1.bf16.msra.mxu1 %v966_v9 }
  0x21   : > { %558 = vmatprep.subr.bf16.mxu0 %v1042_v1  ;;  %921 = vmatprep.subr.bf16.mxu1 %v1042_v1 }
  0x24   : > { %559 = vmatpush1.bf16.msra.mxu0 %v967_v10  ;;  %931 = vmatpush1.bf16.msra.mxu1 %v967_v10 }
  0x25   : > { %560 = vmatprep.subr.bf16.mxu0 %v1042_v1  ;;  %922 = vmatprep.subr.bf16.mxu1 %v1042_v1 }
  0x28   : > { %561 = vmatpush1.bf16.msra.mxu0 %v968_v13  ;;  %932 = vmatpush1.bf16.msra.mxu1 %v968_v13 }
  0x29   : > { %562 = vmatprep.subr.bf16.mxu0 %v1042_v1  ;;  %923 = vmatprep.subr.bf16.mxu1 %v1042_v1 }
  0x2c   : > { %563 = vmatpush1.bf16.msra.mxu0 %v542_v16  ;;  %933 = vmatpush1.bf16.msra.mxu1 %v542_v16 }
  0x2f   : > { %577 = vmatmul.mubr.bf16.vlgmr.msra.gmra.mrb[0].mxu0 %v970_v17  ;;  %641 = vmatmul.mubr.bf16.vlgmr.msra.gmra.mrb[0].mxu1 %v973_v18 }
  0x30   : > { %896 = vmatprep.mubr.msk.bf16.mxu0 %vm488_vm0, %v976_v19  ;;  %904 = vmatprep.mubr.msk.bf16.mxu1 %vm488_vm0, %v978_v20 }
  0x37   : > { %585 = vmatmul.mubr.bf16.gmra.mrb[4].mxu0 %v980_v21  ;;  %649 = vmatmul.mubr.bf16.gmra.mrb[4].mxu1 %v981_v22 }
  0x38   : > { %897 = vmatprep.mubr.msk.bf16.mxu0 %vm488_vm0, %v982_v23  ;;  %905 = vmatprep.mubr.msk.bf16.mxu1 %vm488_vm0, %v984_v24 }
  0x3f   : > { %593 = vmatmul.mubr.bf16.gmra.mrb[8].mxu0 %v986_v25  ;;  %657 = vmatmul.mubr.bf16.gmra.mrb[8].mxu1 %v987_v26 }
  0x40   : > { %898 = vmatprep.mubr.msk.bf16.mxu0 %vm488_vm0, %v988_v27  ;;  %906 = vmatprep.mubr.msk.bf16.mxu1 %vm488_vm0, %v990_v28 }
  0x47   : > { %601 = vmatmul.mubr.bf16.gmra.mrb[12].mxu0 %v992_v29  ;;  %665 = vmatmul.mubr.bf16.gmra.mrb[12].mxu1 %v993_v30 }
  0x48   : > { %899 = vmatprep.mubr.msk.bf16.mxu0 %vm488_vm0, %v994_v31  ;;  %907 = vmatprep.mubr.msk.bf16.mxu1 %vm488_vm0, %v996_v32 }
  0x4f   : > { %609 = vmatmul.mubr.bf16.gmra.mrb[16].mxu0 %v998_v33  ;;  %673 = vmatmul.mubr.bf16.gmra.mrb[16].mxu1 %v999_v34 }
  0x50   : > { %900 = vmatprep.mubr.msk.bf16.mxu0 %vm488_vm0, %v1000_v35  ;;  %908 = vmatprep.mubr.msk.bf16.mxu1 %vm488_vm0, %v1002_v36 }
  0x57   : > { %617 = vmatmul.mubr.bf16.gmra.mrb[20].mxu0 %v1004_v37  ;;  %681 = vmatmul.mubr.bf16.gmra.mrb[20].mxu1 %v1005_v38 }
  0x58   : > { %901 = vmatprep.mubr.msk.bf16.mxu0 %vm488_vm0, %v1006_v39  ;;  %909 = vmatprep.mubr.msk.bf16.mxu1 %vm488_vm0, %v1008_v40 }
  0x5f   : > { %625 = vmatmul.mubr.bf16.gmra.mrb[24].mxu0 %v1010_v41  ;;  %689 = vmatmul.mubr.bf16.gmra.mrb[24].mxu1 %v1011_v42 }
  0x60   : > { %902 = vmatprep.mubr.msk.bf16.mxu0 %vm488_vm0, %v1012_v43  ;;  %910 = vmatprep.mubr.msk.bf16.mxu1 %vm488_vm0, %v1014_v44 }
  0x67   : > { %633 = vmatmul.mubr.bf16.gmra.mrb[28].mxu0 %v1016_v45  ;;  %697 = vmatmul.mubr.bf16.gmra.mrb[28].mxu1 %v1017_v46 }
 0x102   : > { %v578_v48 = vpop.f32.mrb[0].mxu0  ;;  %v642_v49 = vpop.f32.mrb[0].mxu1 }
 0x103   : > { %v579_v50 = vadd.f32 %v1173_v47, %v578_v48  ;;  %v643_v51 = vadd.f32 %v1173_v47, %v642_v49  ;;  %v580_v52 = vpop.f32.mrb[1].mxu0  ;;  %v644_v53 = vpop.f32.mrb[1].mxu1 }
 0x104   : > { %v581_v54 = vpop.f32.mrb[2].mxu0  ;;  %v645_v55 = vpop.f32.mrb[2].mxu1 }
 0x105   : > { %706 = vst.msk [vmem:[%s1180_s21] sm:$0xff] %vm705_vm3, %v579_v50  ;;  %722 = vst.msk [vmem:[%s1180_s21 + $0x80] sm:$0xff] %vm705_vm3, %v643_v51  ;;  %v582_v56 = vadd.f32 %v1173_v47, %v581_v54  ;;  %v646_v57 = vadd.f32 %v1173_v47, %v645_v55  ;;  %v583_v58 = vpop.f32.mrb[3].mxu0  ;;  %v647_v59 = vpop.f32.mrb[3].mxu1 }
 0x107   : > { %707 = vst.msk [vmem:[%s1180_s21 + $0x8] sm:$0xff] %vm705_vm3, %v582_v56  ;;  %723 = vst.msk [vmem:[%s1180_s21 + $0x88] sm:$0xff] %vm705_vm3, %v646_v57 }
 0x10a   : > { %v586_v60 = vpop.f32.mrb[4].mxu0  ;;  %v650_v61 = vpop.f32.mrb[4].mxu1 }
 0x10b   : > { %v587_v62 = vadd.f32 %v1173_v47, %v586_v60  ;;  %v651_v63 = vadd.f32 %v1173_v47, %v650_v61  ;;  %v588_v0 = vpop.f32.mrb[5].mxu0  ;;  %v652_v1 = vpop.f32.mrb[5].mxu1 }
 0x10c   : > { %v589_v2 = vpop.f32.mrb[6].mxu0  ;;  %v653_v3 = vpop.f32.mrb[6].mxu1 }
 0x10d   : > { %708 = vst.msk [vmem:[%s1180_s21 + $0x10] sm:$0xff] %vm705_vm3, %v587_v62  ;;  %724 = vst.msk [vmem:[%s1180_s21 + $0x90] sm:$0xff] %vm705_vm3, %v651_v63  ;;  %v590_v4 = vadd.f32 %v1173_v47, %v589_v2  ;;  %v654_v5 = vadd.f32 %v1173_v47, %v653_v3  ;;  %v591_v6 = vpop.f32.mrb[7].mxu0  ;;  %v655_v7 = vpop.f32.mrb[7].mxu1 }
 0x10f   : > { %709 = vst.msk [vmem:[%s1180_s21 + $0x18] sm:$0xff] %vm705_vm3, %v590_v4  ;;  %725 = vst.msk [vmem:[%s1180_s21 + $0x98] sm:$0xff] %vm705_vm3, %v654_v5 }
 0x112   : > { %v594_v8 = vpop.f32.mrb[8].mxu0  ;;  %v658_v9 = vpop.f32.mrb[8].mxu1 }
 0x113   : > { %v595_v10 = vadd.f32 %v1173_v47, %v594_v8  ;;  %v659_v11 = vadd.f32 %v1173_v47, %v658_v9  ;;  %v596_v12 = vpop.f32.mrb[9].mxu0  ;;  %v660_v13 = vpop.f32.mrb[9].mxu1 }
 0x114   : > { %v597_v14 = vpop.f32.mrb[10].mxu0  ;;  %v661_v15 = vpop.f32.mrb[10].mxu1 }
 0x115   : > { %710 = vst.msk [vmem:[%s1180_s21 + $0x20] sm:$0xff] %vm705_vm3, %v595_v10  ;;  %726 = vst.msk [vmem:[%s1180_s21 + $0xa0] sm:$0xff] %vm705_vm3, %v659_v11  ;;  %v598_v16 = vadd.f32 %v1173_v47, %v597_v14  ;;  %v662_v17 = vadd.f32 %v1173_v47, %v661_v15  ;;  %v599_v18 = vpop.f32.mrb[11].mxu0  ;;  %v663_v19 = vpop.f32.mrb[11].mxu1 }
 0x117   : > { %711 = vst.msk [vmem:[%s1180_s21 + $0x28] sm:$0xff] %vm705_vm3, %v598_v16  ;;  %727 = vst.msk [vmem:[%s1180_s21 + $0xa8] sm:$0xff] %vm705_vm3, %v662_v17 }
 0x11a   : > { %v602_v20 = vpop.f32.mrb[12].mxu0  ;;  %v666_v21 = vpop.f32.mrb[12].mxu1 }
 0x11b   : > { %v603_v22 = vadd.f32 %v1173_v47, %v602_v20  ;;  %v667_v23 = vadd.f32 %v1173_v47, %v666_v21  ;;  %v604_v24 = vpop.f32.mrb[13].mxu0  ;;  %v668_v25 = vpop.f32.mrb[13].mxu1 }
 0x11c   : > { %v605_v26 = vpop.f32.mrb[14].mxu0  ;;  %v669_v27 = vpop.f32.mrb[14].mxu1 }
 0x11d   : > { %712 = vst.msk [vmem:[%s1180_s21 + $0x30] sm:$0xff] %vm705_vm3, %v603_v22  ;;  %728 = vst.msk [vmem:[%s1180_s21 + $0xb0] sm:$0xff] %vm705_vm3, %v667_v23  ;;  %v606_v28 = vadd.f32 %v1173_v47, %v605_v26  ;;  %v670_v29 = vadd.f32 %v1173_v47, %v669_v27  ;;  %v607_v30 = vpop.f32.mrb[15].mxu0  ;;  %v671_v31 = vpop.f32.mrb[15].mxu1 }
 0x11f   : > { %713 = vst.msk [vmem:[%s1180_s21 + $0x38] sm:$0xff] %vm705_vm3, %v606_v28  ;;  %729 = vst.msk [vmem:[%s1180_s21 + $0xb8] sm:$0xff] %vm705_vm3, %v670_v29 }
 0x122   : > { %v610_v32 = vpop.f32.mrb[16].mxu0  ;;  %v674_v33 = vpop.f32.mrb[16].mxu1 }
 0x123   : > { %v611_v34 = vadd.f32 %v1173_v47, %v610_v32  ;;  %v675_v35 = vadd.f32 %v1173_v47, %v674_v33  ;;  %v612_v36 = vpop.f32.mrb[17].mxu0  ;;  %v676_v37 = vpop.f32.mrb[17].mxu1 }
 0x124   : > { %v613_v38 = vpop.f32.mrb[18].mxu0  ;;  %v677_v39 = vpop.f32.mrb[18].mxu1 }
 0x125   : > { %714 = vst.msk [vmem:[%s1180_s21 + $0x40] sm:$0xff] %vm705_vm3, %v611_v34  ;;  %730 = vst.msk [vmem:[%s1180_s21 + $0xc0] sm:$0xff] %vm705_vm3, %v675_v35  ;;  %v614_v40 = vadd.f32 %v1173_v47, %v613_v38  ;;  %v678_v41 = vadd.f32 %v1173_v47, %v677_v39  ;;  %v615_v42 = vpop.f32.mrb[19].mxu0  ;;  %v679_v43 = vpop.f32.mrb[19].mxu1 }
 0x127   : > { %715 = vst.msk [vmem:[%s1180_s21 + $0x48] sm:$0xff] %vm705_vm3, %v614_v40  ;;  %731 = vst.msk [vmem:[%s1180_s21 + $0xc8] sm:$0xff] %vm705_vm3, %v678_v41 }
 0x12a   : > { %v618_v44 = vpop.f32.mrb[20].mxu0  ;;  %v682_v45 = vpop.f32.mrb[20].mxu1 }
 0x12b   : > { %v619_v46 = vadd.f32 %v1173_v47, %v618_v44  ;;  %v683_v48 = vadd.f32 %v1173_v47, %v682_v45  ;;  %v620_v49 = vpop.f32.mrb[21].mxu0  ;;  %v684_v50 = vpop.f32.mrb[21].mxu1 }
 0x12c   : > { %v621_v51 = vpop.f32.mrb[22].mxu0  ;;  %v685_v52 = vpop.f32.mrb[22].mxu1 }
 0x12d   : > { %716 = vst.msk [vmem:[%s1180_s21 + $0x50] sm:$0xff] %vm705_vm3, %v619_v46  ;;  %732 = vst.msk [vmem:[%s1180_s21 + $0xd0] sm:$0xff] %vm705_vm3, %v683_v48  ;;  %v622_v53 = vadd.f32 %v1173_v47, %v621_v51  ;;  %v686_v54 = vadd.f32 %v1173_v47, %v685_v52  ;;  %v623_v55 = vpop.f32.mrb[23].mxu0  ;;  %v687_v56 = vpop.f32.mrb[23].mxu1 }
 0x12f   : > { %717 = vst.msk [vmem:[%s1180_s21 + $0x58] sm:$0xff] %vm705_vm3, %v622_v53  ;;  %733 = vst.msk [vmem:[%s1180_s21 + $0xd8] sm:$0xff] %vm705_vm3, %v686_v54 }
 0x132   : > { %v626_v57 = vpop.f32.mrb[24].mxu0  ;;  %v690_v58 = vpop.f32.mrb[24].mxu1 }
 0x133   : > { %v627_v59 = vadd.f32 %v1173_v47, %v626_v57  ;;  %v691_v60 = vadd.f32 %v1173_v47, %v690_v58  ;;  %v628_v61 = vpop.f32.mrb[25].mxu0  ;;  %v692_v62 = vpop.f32.mrb[25].mxu1 }
 0x134   : > { %v629_v63 = vpop.f32.mrb[26].mxu0  ;;  %v693_v0 = vpop.f32.mrb[26].mxu1 }
 0x135   : > { %718 = vst.msk [vmem:[%s1180_s21 + $0x60] sm:$0xff] %vm705_vm3, %v627_v59  ;;  %734 = vst.msk [vmem:[%s1180_s21 + $0xe0] sm:$0xff] %vm705_vm3, %v691_v60  ;;  %v630_v1 = vadd.f32 %v1173_v47, %v629_v63  ;;  %v694_v2 = vadd.f32 %v1173_v47, %v693_v0  ;;  %v631_v3 = vpop.f32.mrb[27].mxu0  ;;  %v695_v4 = vpop.f32.mrb[27].mxu1 }
 0x137   : > { %719 = vst.msk [vmem:[%s1180_s21 + $0x68] sm:$0xff] %vm705_vm3, %v630_v1  ;;  %735 = vst.msk [vmem:[%s1180_s21 + $0xe8] sm:$0xff] %vm705_vm3, %v694_v2 }
 0x13a   : > { %v634_v5 = vpop.f32.mrb[28].mxu0  ;;  %v698_v6 = vpop.f32.mrb[28].mxu1 }
 0x13b   : > { %v635_v7 = vadd.f32 %v1173_v47, %v634_v5  ;;  %v699_v8 = vadd.f32 %v1173_v47, %v698_v6  ;;  %v636_v9 = vpop.f32.mrb[29].mxu0  ;;  %v700_v10 = vpop.f32.mrb[29].mxu1 }
 0x13c   : > { %v637_v11 = vpop.f32.mrb[30].mxu0  ;;  %v701_v12 = vpop.f32.mrb[30].mxu1 }
 0x13d   : > { %720 = vst.msk [vmem:[%s1180_s21 + $0x70] sm:$0xff] %vm705_vm3, %v635_v7  ;;  %736 = vst.msk [vmem:[%s1180_s21 + $0xf0] sm:$0xff] %vm705_vm3, %v699_v8  ;;  %v638_v13 = vadd.f32 %v1173_v47, %v637_v11  ;;  %v702_v14 = vadd.f32 %v1173_v47, %v701_v12  ;;  %v639_v15 = vpop.f32.mrb[31].mxu0  ;;  %v703_v16 = vpop.f32.mrb[31].mxu1 }
 0x13f   : > { %721 = vst.msk [vmem:[%s1180_s21 + $0x78] sm:$0xff] %vm705_vm3, %v638_v13  ;;  %737 = vst.msk [vmem:[%s1180_s21 + $0xf8] sm:$0xff] %vm705_vm3, %v702_v14 }
 0x140 PF: > { %s13_s14 = sadd.s32 1, %s1040_s14   ;;  %s1291_s12 = smov %s1036_s13 }
 0x141   : > { %p10_p5 = scmp.ge.s32.totalorder %s13_s14, 4   ;;  %s1292_s13 = smov %s1294_s15 }
 0x143   :  { %12 = sbr.rel (!%p10_p5) target bundleno = 2 (0x2), region = 68 }

</bundles_post_ra>
